<compile_context>
chip_gen: v7x
topology: tpu7x:2x2x1
jax: 0.10.0
libtpu: 0.0.40
codegen_flags: <defaults>
</compile_context>

<pallas_src>
import functools

import numpy as np
import jax
import jax.numpy as jnp
from jax.experimental import pallas as pl
from jax.experimental.pallas import tpu as pltpu

BN_EPS = 1e-5


# ----------------------------------------------------------------------------
# Host-side (one-time) parameter repacking into MXU-friendly operators.
# ----------------------------------------------------------------------------
def _upsample_pad_matrix(n_in, n_target):
    """(n_target, n_in): bilinear 2x upsample (align_corners=True) followed by
    F.pad-with-zeros to n_target, expressed as a linear operator."""
    n_up = 2 * n_in
    lo = (n_target - n_up) // 2
    m = np.zeros((n_target, n_in), np.float32)
    for o in range(n_up):
        pos = o * (n_in - 1) / (n_up - 1) if n_up > 1 else 0.0
        i0 = int(np.floor(pos))
        i1 = min(i0 + 1, n_in - 1)
        f = pos - i0
        m[lo + o, i0] += 1.0 - f
        m[lo + o, i1] += f
    return m


def _block_diag(block, n):
    r, c = block.shape
    out = np.zeros((n * r, n * c), np.float32)
    for i in range(n):
        out[i * r:(i + 1) * r, i * c:(i + 1) * c] = block
    return out


def _band_conv_cmajor(w, W):
    """3x3 conv (padding=1) as per-vertical-tap banded matrices.
    Input lanes: c*W + wi (channel-major); output lanes: wo*cout + co.
    Horizontal taps + horizontal zero pad baked into the band."""
    _, _, cin, cout = w.shape
    band = np.zeros((3, cin * W, W * cout), np.float32)
    for kh in range(3):
        for kw in range(3):
            for wo in range(W):
                wi = wo + kw - 1
                if 0 <= wi < W:
                    for c in range(cin):
                        band[kh, c * W + wi, wo * cout:(wo + 1) * cout] += w[kh, kw, c]
    return band


def _band_conv_wmajor(w, W):
    """Same as above but input lanes are w-major: wi*cin + ci (conv1's output
    layout); output lanes: wo*cout + co."""
    _, _, cin, cout = w.shape
    band = np.zeros((3, W * cin, W * cout), np.float32)
    for kh in range(3):
        for kw in range(3):
            for wo in range(W):
                wi = wo + kw - 1
                if 0 <= wi < W:
                    band[kh, wi * cin:(wi + 1) * cin,
                         wo * cout:(wo + 1) * cout] += w[kh, kw]
    return band


def _bn_selectors(W, C):
    """0/1 matrices mapping the (w-major, c-minor) lane layout to channels and
    back: s_lc (W*C, C) sums lanes with lane % C == co; s_cl = s_lc.T."""
    lane = np.arange(W * C)
    s_lc = (lane[:, None] % C == np.arange(C)[None, :]).astype(np.float32)
    return s_lc, np.ascontiguousarray(s_lc.T)


def prepare_up_params(w1, b1, g1, be1, w2, b2, g2, be2, *,
                      x1_shape, x2_shape, param_dtype=jnp.bfloat16):
    """One-time host-side repack. Weight layout: (kh, kw, cin, cout); conv1's
    input channels are ordered [x2 channels, x1 channels] (torch.cat([x2, x1])).
    Conv biases b1/b2 are dropped: they cancel exactly under batch-stat BN."""
    del b1, b2
    N, c1, H1, W1 = x1_shape
    _, c2, H2, W2 = x2_shape
    w1 = np.asarray(w1, np.float32)
    w2 = np.asarray(w2, np.float32)
    assert w1.shape[2] == c1 + c2
    cmid = w1.shape[-1]
    cout = w2.shape[-1]

    uh = _upsample_pad_matrix(H1, H2)                    # (H2, H1)
    uw = _upsample_pad_matrix(W1, W2)                    # (W2, W1)
    uwop = _block_diag(np.ascontiguousarray(uw.T), c1)   # (c1*W1, c1*W2)
    # TODO(synk): when adding a batch/row grid for v7x, apply uh per-sample
    # instead of this (N*H2, N*H1) block-diagonal operator.
    uhop = _block_diag(uh, N)                            # (N*H2, N*H1)

    band1 = _band_conv_cmajor(w1, W2)                    # (3, (c2+c1)*W2, W2*cmid)
    band2 = _band_conv_wmajor(w2, W2)                    # (3, W2*cmid, W2*cout)

    s1lc, s1cl = _bn_selectors(W2, cmid)
    s2lc, s2cl = _bn_selectors(W2, cout)

    p1 = np.stack([np.asarray(g1), np.asarray(be1)]).astype(np.float32)
    p2 = np.stack([np.asarray(g2), np.asarray(be2)]).astype(np.float32)

    asd = lambda a: jnp.asarray(a, param_dtype)      # MXU operands (bf16 by default)
    asf = lambda a: jnp.asarray(a, jnp.float32)      # BN / selector math stays f32
    return (asd(uwop), asd(uhop), asd(band1), asd(band2),
            asf(s1lc), asf(s1cl), asf(s2lc), asf(s2cl), asf(p1), asf(p2))


# ----------------------------------------------------------------------------
# Kernel
# ----------------------------------------------------------------------------
def _bn_relu_lane(y, gamma, beta, s_lc, s_cl, inv_count):
    """Training-mode BatchNorm2d (batch stats, biased var) + ReLU on a
    (rows, W*C) lane layout. Single-pass sum / sum-of-squares folded into one
    scale/shift; lane<->channel reductions/broadcasts are tiny 0/1 matmuls.
    All stats math in f32."""
    f32 = jnp.float32
    colsum = jnp.sum(y, axis=0, keepdims=True)                    # (1, W*C)
    colsq = jnp.sum(y * y, axis=0, keepdims=True)                 # (1, W*C)
    s = jnp.dot(colsum, s_lc, preferred_element_type=f32)         # (1, C)
    ss = jnp.dot(colsq, s_lc, preferred_element_type=f32)         # (1, C)
    mean = s * inv_count
    var = ss * inv_count - mean * mean
    scale = gamma * jax.lax.rsqrt(var + BN_EPS)
    shift = beta - mean * scale
    scale_l = jnp.dot(scale, s_cl, preferred_element_type=f32)    # (1, W*C)
    shift_l = jnp.dot(shift, s_cl, preferred_element_type=f32)
    return jnp.maximum(y * scale_l + shift_l, 0.0)


def _up_double_conv_kernel(x1_ref, x2_ref, uw_ref, uh_ref, band1_ref, band2_ref,
                           s1lc_ref, s1cl_ref, s2lc_ref, s2cl_ref,
                           p1_ref, p2_ref, out_ref,
                           *, N, H, W, cmid, cout):
    f32 = jnp.float32
    cdt = band1_ref.dtype                      # compute dtype for MXU operands
    R = N * H
    inv_count = 1.0 / float(N * H * W)

    # ---- x1 branch: separable bilinear 2x upsample + F.pad as two small matmuls
    xw = jnp.dot(x1_ref[...].astype(cdt), uw_ref[...],
                 preferred_element_type=f32)                       # (N*H1, c1*W)
    x1up = jnp.dot(uh_ref[...], xw.astype(cdt),
                   preferred_element_type=f32)                     # (R, c1*W)

    # ---- torch.cat([x2, x1], dim=1) == lane concat in the channel-major layout
    xcat = jnp.concatenate([x2_ref[...], x1up], axis=-1)           # (R, cin*W)
    cinW = xcat.shape[-1]

    # ---- conv1: vertical pad = 2-row concat; horizontal taps live in the band
    zrow1 = jnp.zeros((N, 1, cinW), cdt)
    xpad = jnp.concatenate([zrow1, xcat.astype(cdt).reshape(N, H, cinW), zrow1],
                           axis=1)                                 # (N, H+2, cin*W)
    y1 = jnp.zeros((R, W * cmid), f32)
    for kh in range(3):
        xs = xpad[:, kh:kh + H, :].reshape(R, cinW)
        y1 = y1 + jnp.dot(xs, band1_ref[kh], preferred_element_type=f32)

    z1 = _bn_relu_lane(y1, p1_ref[0:1, :], p1_ref[1:2, :],
                       s1lc_ref[...], s1cl_ref[...], inv_count)    # (R, W*cmid)

    # ---- conv2
    zrow2 = jnp.zeros((N, 1, W * cmid), cdt)
    zpad = jnp.concatenate([zrow2, z1.astype(cdt).reshape(N, H, W * cmid), zrow2],
                           axis=1)                                 # (N, H+2, W*cmid)
    y2 = jnp.zeros((R, W * cout), f32)
    for kh in range(3):
        xs = zpad[:, kh:kh + H, :].reshape(R, W * cmid)
        y2 = y2 + jnp.dot(xs, band2_ref[kh], preferred_element_type=f32)

    z2 = _bn_relu_lane(y2, p2_ref[0:1, :], p2_ref[1:2, :],
                       s2lc_ref[...], s2cl_ref[...], inv_count)

    out_ref[...] = z2        # (N*H, W*cout) = (32, 128): fully lane-dense store


# ----------------------------------------------------------------------------
# Wrapper (PyTorch-facing NCHW interface)
# ----------------------------------------------------------------------------
@jax.jit
def up_forward(x1_nchw, x2_nchw, prepared):
    """Equivalent of Up.forward(x1, x2) with bilinear=True. NCHW in / NCHW out."""
    uwop, uhop, band1, band2, s1lc, s1cl, s2lc, s2cl, p1, p2 = prepared
    N, c1, H1, W1 = x1_nchw.shape
    _, c2, H, W = x2_nchw.shape
    cmid = p1.shape[1]
    cout = p2.shape[1]

    # Lane-dense row layouts: rows = (n, h), lanes = c*W + w (channel-major).
    x1_rows = jnp.transpose(x1_nchw, (0, 2, 1, 3)).reshape(N * H1, c1 * W1)
    x2_rows = jnp.transpose(x2_nchw, (0, 2, 1, 3)).reshape(N * H, c2 * W)

    kernel = functools.partial(_up_double_conv_kernel,
                               N=N, H=H, W=W, cmid=cmid, cout=cout)
    out2d = pl.pallas_call(
        kernel,
        out_shape=jax.ShapeDtypeStruct((N * H, W * cout), jnp.float32),
        in_specs=[pl.BlockSpec(memory_space=pltpu.MemorySpace.VMEM)] * 12,
        out_specs=pl.BlockSpec(memory_space=pltpu.MemorySpace.VMEM),
        # TODO(synk): for real UNet sizes / v7x, add a row-tiled grid with
        # "parallel" semantics and a two-pass (accumulate + finalize) BN so the
        # batch statistics stay global over (N, H, W).
    )(x1_rows, x2_rows, uwop, uhop, band1, band2,
      s1lc, s1cl, s2lc, s2cl, p1, p2)

    out = out2d.reshape(N, H, W, cout)
    return jnp.transpose(out, (0, 3, 1, 2))   # back to NCHW (only remaining glue)


# ----------------------------------------------------------------------------
# Pure-JAX reference (validation only)
# ----------------------------------------------------------------------------
def _upsample_bilinear_x2_align_corners(x):
    N, H, W, C = x.shape
    Ho, Wo = 2 * H, 2 * W
    ys = jnp.arange(Ho, dtype=jnp.float32) * (H - 1) / (Ho - 1)
    xs = jnp.arange(Wo, dtype=jnp.float32) * (W - 1) / (Wo - 1)
    y0 = jnp.floor(ys).astype(jnp.int32); y1 = jnp.minimum(y0 + 1, H - 1)
    x0 = jnp.floor(xs).astype(jnp.int32); x1 = jnp.minimum(x0 + 1, W - 1)
    wy = (ys - y0.astype(jnp.float32))[None, :, None, None]
    wx = (xs - x0.astype(jnp.float32))[None, None, :, None]
    r0, r1 = x[:, y0], x[:, y1]
    a, b = r0[:, :, x0], r0[:, :, x1]
    c, d = r1[:, :, x0], r1[:, :, x1]
    return a * (1 - wy) * (1 - wx) + b * (1 - wy) * wx + c * wy * (1 - wx) + d * wy * wx


def _reference_up_forward(x1_nchw, x2_nchw, raw_params):
    w1, b1, g1, be1, w2, b2, g2, be2 = raw_params
    x1 = jnp.transpose(x1_nchw, (0, 2, 3, 1))
    x2 = jnp.transpose(x2_nchw, (0, 2, 3, 1))
    x1 = _upsample_bilinear_x2_align_corners(x1)
    dY = x2.shape[1] - x1.shape[1]
    dX = x2.shape[2] - x1.shape[2]
    x1 = jnp.pad(x1, ((0, 0), (dY // 2, dY - dY // 2),
                      (dX // 2, dX - dX // 2), (0, 0)))
    x = jnp.concatenate([x2, x1], axis=-1)

    def conv_bn_relu(xin, w, b, g, be):
        y = jax.lax.conv_general_dilated(
            xin, w, window_strides=(1, 1), padding=((1, 1), (1, 1)),
            dimension_numbers=('NHWC', 'HWIO', 'NHWC')) + b
        m = jnp.mean(y, axis=(0, 1, 2))
        v = jnp.mean(jnp.square(y - m), axis=(0, 1, 2))
        return jnp.maximum(g * (y - m) * jax.lax.rsqrt(v + BN_EPS) + be, 0.0)

    y = conv_bn_relu(x, w1, b1, g1, be1)
    y = conv_bn_relu(y, w2, b2, g2, be2)
    return jnp.transpose(y, (0, 3, 1, 2))


if __name__ == "__main__":
    key = jax.random.PRNGKey(0)
    keys = jax.random.split(key, 10)

    # Up(in_channels=8, out_channels=8, bilinear=True) => mid_channels = 4
    #   x1: (2, 4, 8, 8)  -> upsampled to (2, 4, 16, 16)
    #   x2: (2, 4, 16, 16);  concat -> 8 channels == in_channels
    N = 2
    in_channels, out_channels = 8, 8
    cmid = in_channels // 2
    c1 = in_channels // 2
    c2 = in_channels - c1
    H1, W1 = 8, 8
    H2, W2 = 16, 16

    x1 = jax.random.normal(keys[0], (N, c1, H1, W1), jnp.float32)
    x2 = jax.random.normal(keys[1], (N, c2, H2, W2), jnp.float32)

    # Deterministic parameter init (shapes follow DoubleConv(8, 8, mid=4)).
    w1 = 0.1 * jax.random.normal(keys[2], (3, 3, in_channels, cmid), jnp.float32)
    b1 = 0.1 * jax.random.normal(keys[3], (cmid,), jnp.float32)
    g1 = 1.0 + 0.1 * jax.random.normal(keys[4], (cmid,), jnp.float32)
    be1 = 0.1 * jax.random.normal(keys[5], (cmid,), jnp.float32)
    w2 = 0.1 * jax.random.normal(keys[6], (3, 3, cmid, out_channels), jnp.float32)
    b2 = 0.1 * jax.random.normal(keys[7], (out_channels,), jnp.float32)
    g2 = 1.0 + 0.1 * jax.random.normal(keys[8], (out_channels,), jnp.float32)
    be2 = 0.1 * jax.random.normal(keys[9], (out_channels,), jnp.float32)

    raw = (w1, b1, g1, be1, w2, b2, g2, be2)
    ref = _reference_up_forward(x1, x2, raw)

    # --- f32 operands: tight parity check ---
    prepared_f32 = prepare_up_params(*raw, x1_shape=x1.shape, x2_shape=x2.shape,
                                     param_dtype=jnp.float32)
    out_f32 = up_forward(x1, x2, prepared_f32)
    jax.block_until_ready(out_f32)
    assert out_f32.shape == (N, out_channels, H2, W2), out_f32.shape
    assert bool(jnp.all(jnp.isfinite(out_f32)))
    err_f32 = float(jnp.max(jnp.abs(out_f32 - ref)))
    assert err_f32 < 2e-3, f"f32 max abs err vs reference: {err_f32}"

    # --- bf16 MXU operands (default / perf config): looser tolerance ---
    prepared_bf16 = prepare_up_params(*raw, x1_shape=x1.shape, x2_shape=x2.shape,
                                      param_dtype=jnp.bfloat16)
    out_bf16 = up_forward(x1, x2, prepared_bf16)
    jax.block_until_ready(out_bf16)
    assert out_bf16.shape == (N, out_channels, H2, W2), out_bf16.shape
    assert bool(jnp.all(jnp.isfinite(out_bf16)))
    err_bf16 = float(jnp.max(jnp.abs(out_bf16 - ref)))
    assert err_bf16 < 1e-1, f"bf16 max abs err vs reference: {err_bf16}"

    print("KERNEL_OK")
</pallas_src>

<mosaic_0001>
module attributes {stable_mosaic.version = 11 : i64} {
  func.func @_up_double_conv_kernel(%arg0: memref<16x32xf32, #tpu.memory_space<vmem>>, %arg1: memref<32x64xf32, #tpu.memory_space<vmem>>, %arg2: memref<32x64xf32, #tpu.memory_space<vmem>>, %arg3: memref<32x16xf32, #tpu.memory_space<vmem>>, %arg4: memref<3x128x64xf32, #tpu.memory_space<vmem>>, %arg5: memref<3x64x128xf32, #tpu.memory_space<vmem>>, %arg6: memref<64x4xf32, #tpu.memory_space<vmem>>, %arg7: memref<4x64xf32, #tpu.memory_space<vmem>>, %arg8: memref<128x8xf32, #tpu.memory_space<vmem>>, %arg9: memref<8x128xf32, #tpu.memory_space<vmem>>, %arg10: memref<2x4xf32, #tpu.memory_space<vmem>>, %arg11: memref<2x8xf32, #tpu.memory_space<vmem>>, %arg12: memref<32x128xf32, #tpu.memory_space<vmem>>) attributes {dimension_semantics = [], scalar_prefetch = 0 : i64, scratch_operands = 0 : i64, tpu.core_type = #tpu.core_type<tc>} {
    %c0 = arith.constant 0 : index
    %c0_0 = arith.constant 0 : index
    %0 = vector.load %arg0[%c0, %c0_0] : memref<16x32xf32, #tpu.memory_space<vmem>>, vector<16x32xf32>
    %c0_1 = arith.constant 0 : index
    %c0_2 = arith.constant 0 : index
    %1 = vector.load %arg2[%c0_1, %c0_2] : memref<32x64xf32, #tpu.memory_space<vmem>>, vector<32x64xf32>
    %cst = arith.constant dense<0.000000e+00> : vector<16x64xf32>
    %2 = tpu.matmul %0, %1, %cst {dimension_numbers = #tpu.dot_dimension_numbers<[1], [0], [0], [1], [0, 0, 1, 1], [], []>} : vector<16x32xf32>, vector<32x64xf32>, vector<16x64xf32> -> vector<16x64xf32>
    %c0_3 = arith.constant 0 : index
    %c0_4 = arith.constant 0 : index
    %3 = vector.load %arg3[%c0_3, %c0_4] : memref<32x16xf32, #tpu.memory_space<vmem>>, vector<32x16xf32>
    %cst_5 = arith.constant dense<0.000000e+00> : vector<32x64xf32>
    %4 = tpu.matmul %3, %2, %cst_5 {dimension_numbers = #tpu.dot_dimension_numbers<[1], [0], [0], [1], [0, 0, 1, 1], [], []>} : vector<32x16xf32>, vector<16x64xf32>, vector<32x64xf32> -> vector<32x64xf32>
    %c0_6 = arith.constant 0 : index
    %c0_7 = arith.constant 0 : index
    %5 = vector.load %arg1[%c0_6, %c0_7] : memref<32x64xf32, #tpu.memory_space<vmem>>, vector<32x64xf32>
    %6 = tpu.concatenate %5, %4 in 1 : vector<32x64xf32>, vector<32x64xf32> -> vector<32x128xf32>
    %cst_8 = arith.constant 0.000000e+00 : f32
    %7 = vector.broadcast %cst_8 : f32 to vector<2x1x128xf32>
    %8 = vector.shape_cast %6 : vector<32x128xf32> to vector<2x16x128xf32>
    %9 = tpu.concatenate %7, %8, %7 in 1 : vector<2x1x128xf32>, vector<2x16x128xf32>, vector<2x1x128xf32> -> vector<2x18x128xf32>
    %cst_9 = arith.constant 0.000000e+00 : f32
    %10 = vector.broadcast %cst_9 : f32 to vector<32x64xf32>
    %11 = vector.extract_strided_slice %9 {offsets = [0, 0, 0], sizes = [2, 16, 128], strides = [1, 1, 1]} : vector<2x18x128xf32> to vector<2x16x128xf32>
    %12 = vector.shape_cast %11 : vector<2x16x128xf32> to vector<32x128xf32>
    %c0_10 = arith.constant 0 : index
    %c0_11 = arith.constant 0 : index
    %c0_12 = arith.constant 0 : index
    %13 = vector.load %arg4[%c0_10, %c0_11, %c0_12] : memref<3x128x64xf32, #tpu.memory_space<vmem>>, vector<1x128x64xf32>
    %14 = vector.shape_cast %13 : vector<1x128x64xf32> to vector<128x64xf32>
    %cst_13 = arith.constant dense<0.000000e+00> : vector<32x64xf32>
    %15 = tpu.matmul %12, %14, %cst_13 {dimension_numbers = #tpu.dot_dimension_numbers<[1], [0], [0], [1], [0, 0, 1, 1], [], []>} : vector<32x128xf32>, vector<128x64xf32>, vector<32x64xf32> -> vector<32x64xf32>
    %16 = arith.addf %10, %15 : vector<32x64xf32>
    %17 = vector.extract_strided_slice %9 {offsets = [0, 1, 0], sizes = [2, 16, 128], strides = [1, 1, 1]} : vector<2x18x128xf32> to vector<2x16x128xf32>
    %18 = vector.shape_cast %17 : vector<2x16x128xf32> to vector<32x128xf32>
    %c1 = arith.constant 1 : index
    %c0_14 = arith.constant 0 : index
    %c0_15 = arith.constant 0 : index
    %19 = vector.load %arg4[%c1, %c0_14, %c0_15] : memref<3x128x64xf32, #tpu.memory_space<vmem>>, vector<1x128x64xf32>
    %20 = vector.shape_cast %19 : vector<1x128x64xf32> to vector<128x64xf32>
    %cst_16 = arith.constant dense<0.000000e+00> : vector<32x64xf32>
    %21 = tpu.matmul %18, %20, %cst_16 {dimension_numbers = #tpu.dot_dimension_numbers<[1], [0], [0], [1], [0, 0, 1, 1], [], []>} : vector<32x128xf32>, vector<128x64xf32>, vector<32x64xf32> -> vector<32x64xf32>
    %22 = arith.addf %16, %21 : vector<32x64xf32>
    %23 = vector.extract_strided_slice %9 {offsets = [0, 2, 0], sizes = [2, 16, 128], strides = [1, 1, 1]} : vector<2x18x128xf32> to vector<2x16x128xf32>
    %24 = vector.shape_cast %23 : vector<2x16x128xf32> to vector<32x128xf32>
    %c2 = arith.constant 2 : index
    %c0_17 = arith.constant 0 : index
    %c0_18 = arith.constant 0 : index
    %25 = vector.load %arg4[%c2, %c0_17, %c0_18] : memref<3x128x64xf32, #tpu.memory_space<vmem>>, vector<1x128x64xf32>
    %26 = vector.shape_cast %25 : vector<1x128x64xf32> to vector<128x64xf32>
    %cst_19 = arith.constant dense<0.000000e+00> : vector<32x64xf32>
    %27 = tpu.matmul %24, %26, %cst_19 {dimension_numbers = #tpu.dot_dimension_numbers<[1], [0], [0], [1], [0, 0, 1, 1], [], []>} : vector<32x128xf32>, vector<128x64xf32>, vector<32x64xf32> -> vector<32x64xf32>
    %28 = arith.addf %22, %27 : vector<32x64xf32>
    %c0_20 = arith.constant 0 : index
    %c0_21 = arith.constant 0 : index
    %29 = vector.load %arg10[%c0_20, %c0_21] : memref<2x4xf32, #tpu.memory_space<vmem>>, vector<1x4xf32>
    %c1_22 = arith.constant 1 : index
    %c0_23 = arith.constant 0 : index
    %30 = vector.load %arg10[%c1_22, %c0_23] : memref<2x4xf32, #tpu.memory_space<vmem>>, vector<1x4xf32>
    %c0_24 = arith.constant 0 : index
    %c0_25 = arith.constant 0 : index
    %31 = vector.load %arg6[%c0_24, %c0_25] : memref<64x4xf32, #tpu.memory_space<vmem>>, vector<64x4xf32>
    %c0_26 = arith.constant 0 : index
    %c0_27 = arith.constant 0 : index
    %32 = vector.load %arg7[%c0_26, %c0_27] : memref<4x64xf32, #tpu.memory_space<vmem>>, vector<4x64xf32>
    %cst_28 = arith.constant dense<0.000000e+00> : vector<64xf32>
    %33 = vector.multi_reduction <add>, %28, %cst_28 [0] : vector<32x64xf32> to vector<64xf32>
    %34 = vector.shape_cast %33 : vector<64xf32> to vector<1x64xf32>
    %35 = arith.mulf %28, %28 : vector<32x64xf32>
    %cst_29 = arith.constant dense<0.000000e+00> : vector<64xf32>
    %36 = vector.multi_reduction <add>, %35, %cst_29 [0] : vector<32x64xf32> to vector<64xf32>
    %37 = vector.shape_cast %36 : vector<64xf32> to vector<1x64xf32>
    %cst_30 = arith.constant dense<0.000000e+00> : vector<1x4xf32>
    %38 = tpu.matmul %34, %31, %cst_30 {dimension_numbers = #tpu.dot_dimension_numbers<[1], [0], [0], [1], [0, 0, 1, 1], [], []>} : vector<1x64xf32>, vector<64x4xf32>, vector<1x4xf32> -> vector<1x4xf32>
    %cst_31 = arith.constant dense<0.000000e+00> : vector<1x4xf32>
    %39 = tpu.matmul %37, %31, %cst_31 {dimension_numbers = #tpu.dot_dimension_numbers<[1], [0], [0], [1], [0, 0, 1, 1], [], []>} : vector<1x64xf32>, vector<64x4xf32>, vector<1x4xf32> -> vector<1x4xf32>
    %cst_32 = arith.constant 0.001953125 : f32
    %40 = vector.broadcast %cst_32 : f32 to vector<1x4xf32>
    %41 = arith.mulf %38, %40 : vector<1x4xf32>
    %cst_33 = arith.constant 0.001953125 : f32
    %42 = vector.broadcast %cst_33 : f32 to vector<1x4xf32>
    %43 = arith.mulf %39, %42 : vector<1x4xf32>
    %44 = arith.mulf %41, %41 : vector<1x4xf32>
    %45 = arith.subf %43, %44 : vector<1x4xf32>
    %cst_34 = arith.constant 9.99999974E-6 : f32
    %46 = vector.broadcast %cst_34 : f32 to vector<1x4xf32>
    %47 = arith.addf %45, %46 : vector<1x4xf32>
    %48 = math.rsqrt %47 : vector<1x4xf32>
    %49 = arith.mulf %29, %48 : vector<1x4xf32>
    %50 = arith.mulf %41, %49 : vector<1x4xf32>
    %51 = arith.subf %30, %50 : vector<1x4xf32>
    %cst_35 = arith.constant dense<0.000000e+00> : vector<1x64xf32>
    %52 = tpu.matmul %49, %32, %cst_35 {dimension_numbers = #tpu.dot_dimension_numbers<[1], [0], [0], [1], [0, 0, 1, 1], [], []>} : vector<1x4xf32>, vector<4x64xf32>, vector<1x64xf32> -> vector<1x64xf32>
    %cst_36 = arith.constant dense<0.000000e+00> : vector<1x64xf32>
    %53 = tpu.matmul %51, %32, %cst_36 {dimension_numbers = #tpu.dot_dimension_numbers<[1], [0], [0], [1], [0, 0, 1, 1], [], []>} : vector<1x4xf32>, vector<4x64xf32>, vector<1x64xf32> -> vector<1x64xf32>
    %54 = vector.broadcast %52 : vector<1x64xf32> to vector<32x64xf32>
    %55 = arith.mulf %28, %54 : vector<32x64xf32>
    %56 = vector.broadcast %53 : vector<1x64xf32> to vector<32x64xf32>
    %57 = arith.addf %55, %56 : vector<32x64xf32>
    %cst_37 = arith.constant 0.000000e+00 : f32
    %58 = vector.broadcast %cst_37 : f32 to vector<32x64xf32>
    %59 = arith.maximumf %57, %58 : vector<32x64xf32>
    %cst_38 = arith.constant 0.000000e+00 : f32
    %60 = vector.broadcast %cst_38 : f32 to vector<2x1x64xf32>
    %61 = vector.shape_cast %59 : vector<32x64xf32> to vector<2x16x64xf32>
    %62 = tpu.concatenate %60, %61, %60 in 1 : vector<2x1x64xf32>, vector<2x16x64xf32>, vector<2x1x64xf32> -> vector<2x18x64xf32>
    %cst_39 = arith.constant 0.000000e+00 : f32
    %63 = vector.broadcast %cst_39 : f32 to vector<32x128xf32>
    %64 = vector.extract_strided_slice %62 {offsets = [0, 0, 0], sizes = [2, 16, 64], strides = [1, 1, 1]} : vector<2x18x64xf32> to vector<2x16x64xf32>
    %65 = vector.shape_cast %64 : vector<2x16x64xf32> to vector<32x64xf32>
    %c0_40 = arith.constant 0 : index
    %c0_41 = arith.constant 0 : index
    %c0_42 = arith.constant 0 : index
    %66 = vector.load %arg5[%c0_40, %c0_41, %c0_42] : memref<3x64x128xf32, #tpu.memory_space<vmem>>, vector<1x64x128xf32>
    %67 = vector.shape_cast %66 : vector<1x64x128xf32> to vector<64x128xf32>
    %cst_43 = arith.constant dense<0.000000e+00> : vector<32x128xf32>
    %68 = tpu.matmul %65, %67, %cst_43 {dimension_numbers = #tpu.dot_dimension_numbers<[1], [0], [0], [1], [0, 0, 1, 1], [], []>} : vector<32x64xf32>, vector<64x128xf32>, vector<32x128xf32> -> vector<32x128xf32>
    %69 = arith.addf %63, %68 : vector<32x128xf32>
    %70 = vector.extract_strided_slice %62 {offsets = [0, 1, 0], sizes = [2, 16, 64], strides = [1, 1, 1]} : vector<2x18x64xf32> to vector<2x16x64xf32>
    %71 = vector.shape_cast %70 : vector<2x16x64xf32> to vector<32x64xf32>
    %c1_44 = arith.constant 1 : index
    %c0_45 = arith.constant 0 : index
    %c0_46 = arith.constant 0 : index
    %72 = vector.load %arg5[%c1_44, %c0_45, %c0_46] : memref<3x64x128xf32, #tpu.memory_space<vmem>>, vector<1x64x128xf32>
    %73 = vector.shape_cast %72 : vector<1x64x128xf32> to vector<64x128xf32>
    %cst_47 = arith.constant dense<0.000000e+00> : vector<32x128xf32>
    %74 = tpu.matmul %71, %73, %cst_47 {dimension_numbers = #tpu.dot_dimension_numbers<[1], [0], [0], [1], [0, 0, 1, 1], [], []>} : vector<32x64xf32>, vector<64x128xf32>, vector<32x128xf32> -> vector<32x128xf32>
    %75 = arith.addf %69, %74 : vector<32x128xf32>
    %76 = vector.extract_strided_slice %62 {offsets = [0, 2, 0], sizes = [2, 16, 64], strides = [1, 1, 1]} : vector<2x18x64xf32> to vector<2x16x64xf32>
    %77 = vector.shape_cast %76 : vector<2x16x64xf32> to vector<32x64xf32>
    %c2_48 = arith.constant 2 : index
    %c0_49 = arith.constant 0 : index
    %c0_50 = arith.constant 0 : index
    %78 = vector.load %arg5[%c2_48, %c0_49, %c0_50] : memref<3x64x128xf32, #tpu.memory_space<vmem>>, vector<1x64x128xf32>
    %79 = vector.shape_cast %78 : vector<1x64x128xf32> to vector<64x128xf32>
    %cst_51 = arith.constant dense<0.000000e+00> : vector<32x128xf32>
    %80 = tpu.matmul %77, %79, %cst_51 {dimension_numbers = #tpu.dot_dimension_numbers<[1], [0], [0], [1], [0, 0, 1, 1], [], []>} : vector<32x64xf32>, vector<64x128xf32>, vector<32x128xf32> -> vector<32x128xf32>
    %81 = arith.addf %75, %80 : vector<32x128xf32>
    %c0_52 = arith.constant 0 : index
    %c0_53 = arith.constant 0 : index
    %82 = vector.load %arg11[%c0_52, %c0_53] : memref<2x8xf32, #tpu.memory_space<vmem>>, vector<1x8xf32>
    %c1_54 = arith.constant 1 : index
    %c0_55 = arith.constant 0 : index
    %83 = vector.load %arg11[%c1_54, %c0_55] : memref<2x8xf32, #tpu.memory_space<vmem>>, vector<1x8xf32>
    %c0_56 = arith.constant 0 : index
    %c0_57 = arith.constant 0 : index
    %84 = vector.load %arg8[%c0_56, %c0_57] : memref<128x8xf32, #tpu.memory_space<vmem>>, vector<128x8xf32>
    %c0_58 = arith.constant 0 : index
    %c0_59 = arith.constant 0 : index
    %85 = vector.load %arg9[%c0_58, %c0_59] : memref<8x128xf32, #tpu.memory_space<vmem>>, vector<8x128xf32>
    %cst_60 = arith.constant dense<0.000000e+00> : vector<128xf32>
    %86 = vector.multi_reduction <add>, %81, %cst_60 [0] : vector<32x128xf32> to vector<128xf32>
    %87 = vector.shape_cast %86 : vector<128xf32> to vector<1x128xf32>
    %88 = arith.mulf %81, %81 : vector<32x128xf32>
    %cst_61 = arith.constant dense<0.000000e+00> : vector<128xf32>
    %89 = vector.multi_reduction <add>, %88, %cst_61 [0] : vector<32x128xf32> to vector<128xf32>
    %90 = vector.shape_cast %89 : vector<128xf32> to vector<1x128xf32>
    %cst_62 = arith.constant dense<0.000000e+00> : vector<1x8xf32>
    %91 = tpu.matmul %87, %84, %cst_62 {dimension_numbers = #tpu.dot_dimension_numbers<[1], [0], [0], [1], [0, 0, 1, 1], [], []>} : vector<1x128xf32>, vector<128x8xf32>, vector<1x8xf32> -> vector<1x8xf32>
    %cst_63 = arith.constant dense<0.000000e+00> : vector<1x8xf32>
    %92 = tpu.matmul %90, %84, %cst_63 {dimension_numbers = #tpu.dot_dimension_numbers<[1], [0], [0], [1], [0, 0, 1, 1], [], []>} : vector<1x128xf32>, vector<128x8xf32>, vector<1x8xf32> -> vector<1x8xf32>
    %cst_64 = arith.constant 0.001953125 : f32
    %93 = vector.broadcast %cst_64 : f32 to vector<1x8xf32>
    %94 = arith.mulf %91, %93 : vector<1x8xf32>
    %cst_65 = arith.constant 0.001953125 : f32
    %95 = vector.broadcast %cst_65 : f32 to vector<1x8xf32>
    %96 = arith.mulf %92, %95 : vector<1x8xf32>
    %97 = arith.mulf %94, %94 : vector<1x8xf32>
    %98 = arith.subf %96, %97 : vector<1x8xf32>
    %cst_66 = arith.constant 9.99999974E-6 : f32
    %99 = vector.broadcast %cst_66 : f32 to vector<1x8xf32>
    %100 = arith.addf %98, %99 : vector<1x8xf32>
    %101 = math.rsqrt %100 : vector<1x8xf32>
    %102 = arith.mulf %82, %101 : vector<1x8xf32>
    %103 = arith.mulf %94, %102 : vector<1x8xf32>
    %104 = arith.subf %83, %103 : vector<1x8xf32>
    %cst_67 = arith.constant dense<0.000000e+00> : vector<1x128xf32>
    %105 = tpu.matmul %102, %85, %cst_67 {dimension_numbers = #tpu.dot_dimension_numbers<[1], [0], [0], [1], [0, 0, 1, 1], [], []>} : vector<1x8xf32>, vector<8x128xf32>, vector<1x128xf32> -> vector<1x128xf32>
    %cst_68 = arith.constant dense<0.000000e+00> : vector<1x128xf32>
    %106 = tpu.matmul %104, %85, %cst_68 {dimension_numbers = #tpu.dot_dimension_numbers<[1], [0], [0], [1], [0, 0, 1, 1], [], []>} : vector<1x8xf32>, vector<8x128xf32>, vector<1x128xf32> -> vector<1x128xf32>
    %107 = vector.broadcast %105 : vector<1x128xf32> to vector<32x128xf32>
    %108 = arith.mulf %81, %107 : vector<32x128xf32>
    %109 = vector.broadcast %106 : vector<1x128xf32> to vector<32x128xf32>
    %110 = arith.addf %108, %109 : vector<32x128xf32>
    %cst_69 = arith.constant 0.000000e+00 : f32
    %111 = vector.broadcast %cst_69 : f32 to vector<32x128xf32>
    %112 = arith.maximumf %110, %111 : vector<32x128xf32>
    %c0_70 = arith.constant 0 : index
    %c0_71 = arith.constant 0 : index
    %113 = vector.load %arg12[%c0_70, %c0_71] : memref<32x128xf32, #tpu.memory_space<vmem>>, vector<32x128xf32>
    tpu.vector_store %arg12[%c0_70, %c0_71], %112 {strides = array<i32>} : memref<32x128xf32, #tpu.memory_space<vmem>>, vector<32x128xf32>,
    return
  }
}

</mosaic_0001>

<bundles_post_ra>
// kernel: up_forward.1
= control target key start
LH: loop header
LB: loop body
LE: loop exit
PB: predicated region body
PF: predicated region fallthrough
CT: control target
= control target key end

     0   :  { %vm47_vm0 = vcmask 261120   ;;  %vm133_vm1 = vcmask 130048   ;;  %vm251_vm2 = vcmask 523264   ;;  %vm260_vm3 = vcmask 1040384   ;;  %s3145_s2 = inlined_call_operand.vmem [shape: f32[32,64], index: 2, kind: input, shape index: {}]   ;;  %s3146_s0 = inlined_call_operand.vmem [shape: f32[16,32], index: 0, kind: input, shape index: {}]   ;;  %s3147_s3 = inlined_call_operand.vmem [shape: f32[32,16], index: 3, kind: input, shape index: {}]   ;;  %s3148_s4 = inlined_call_operand.vmem [shape: f32[3,128,64], index: 4, kind: input, shape index: {}]   ;;  %s3149_s1 = inlined_call_operand.vmem [shape: f32[32,64], index: 1, kind: input, shape index: {}]   ;;  %s3150_s6 = inlined_call_operand.vmem [shape: f32[64,4], index: 6, kind: input, shape index: {}]   ;;  %s3151_s7 = inlined_call_operand.vmem [shape: f32[4,64], index: 7, kind: input, shape index: {}]   ;;  %s3152_s10 = inlined_call_operand.vmem [shape: f32[2,4], index: 10, kind: input, shape index: {}]   ;;  %s3153_s5 = inlined_call_operand.vmem [shape: f32[3,64,128], index: 5, kind: input, shape index: {}]   ;;  %s3154_s8 = inlined_call_operand.vmem [shape: f32[128,8], index: 8, kind: input, shape index: {}]   ;;  %s3155_s9 = inlined_call_operand.vmem [shape: f32[8,128], index: 9, kind: input, shape index: {}]   ;;  %s3156_s11 = inlined_call_operand.vmem [shape: f32[2,8], index: 11, kind: input, shape index: {}]   ;;  %s3157_s12 = inlined_call_operand.vmem [shape: f32[32,128], index: 12, kind: output, shape index: {}]  }
   0x1   :  { %v43_v0 = vld [vmem:[%s3145_s2] sm:$0xff]  ;;  %v44_v1 = vld [vmem:[%s3145_s2 + $0x8] sm:$0xff]  ;;  %v45_v2 = vld [vmem:[%s3145_s2 + $0x10] sm:$0xff]  ;;  %vm297_vm4 = vcmask 1046528   ;;  %vm499_vm6 = vcmask 1045504   ;;  %vm2532_vm7 = vmmov 0  }
   0x2   :  { %v2278_v3 = vpack.c.bf16 %v44_v1, %v43_v0  ;;  %v46_v4 = vld [vmem:[%s3145_s2 + $0x18] sm:$0xff]  ;;  %v41_v5 = vld [vmem:[%s3146_s0] sm:$0xff]  ;;  %v42_v7 = vld [vmem:[%s3146_s0 + $0x8] sm:$0xff]  ;;  %s2530_s2 = smov 64   ;;  %vm820_vm8 = vcmask 1043456   ;;  %vm816_vm9 = vcmask 31744  }
   0x3   :  { %v2282_v6 = vpack.c.bf16 %v46_v4, %v45_v2  ;;  %1957 = vmatprep.mubr.msk.f32.mxu0 %vm47_vm0, %v41_v5  ;;  %v129_v8 = vld [vmem:[%s3147_s3] sm:$0xff]  ;;  %v130_v12 = vld [vmem:[%s3147_s3 + $0x8] sm:$0xff]  ;;  %v131_v13 = vld [vmem:[%s3147_s3 + $0x10] sm:$0xff]  ;;  %vm1528_vm10 = vcmask 64512  }
   0x4   :  { %2279 = vmatprep.subr.bf16.mxu0 %v2278_v3  ;;  %1964 = vmatprep.mubr.msk.f32.mxu1 %vm133_vm1, %v129_v8  ;;  %v132_v14 = vld [vmem:[%s3147_s3 + $0x18] sm:$0xff]  ;;  %v1709_v15 = vld [vmem:[%s3148_s4 + $0x80] sm:$0xff]  ;;  %v1710_v16 = vld [vmem:[%s3148_s4 + $0x88] sm:$0xff] }
   0x5   :  { %2281 = vmatpush3.bf16.msra.mxu0 %v2278_v3  ;;  %v1711_v17 = vld [vmem:[%s3148_s4 + $0x90] sm:$0xff]  ;;  %v2290_v18 = vpack.c.bf16 %v1710_v16, %v1709_v15  ;;  %v1712_v19 = vld [vmem:[%s3148_s4 + $0x98] sm:$0xff]  ;;  %v1713_v21 = vld [vmem:[%s3148_s4 + $0xa0] sm:$0xff] }
   0x6   :  { %2283 = vmatprep.subr.bf16.mxu0 %v2282_v6  ;;  %v2294_v20 = vpack.c.bf16 %v1712_v19, %v1711_v17  ;;  %v1714_v22 = vld [vmem:[%s3148_s4 + $0xa8] sm:$0xff]  ;;  %v1715_v24 = vld [vmem:[%s3148_s4 + $0xb0] sm:$0xff]  ;;  %v1716_v25 = vld [vmem:[%s3148_s4 + $0xb8] sm:$0xff]  ;;  %v2533_v19 = vmov 0.0  }
   0x7   :  { %v2298_v23 = vpack.c.bf16 %v1714_v22, %v1713_v21  ;;  %v2302_v26 = vpack.c.bf16 %v1716_v25, %v1715_v24  ;;  %v1717_v27 = vld [vmem:[%s3148_s4 + $0xc0] sm:$0xff]  ;;  %v1718_v28 = vld [vmem:[%s3148_s4 + $0xc8] sm:$0xff]  ;;  %v1719_v30 = vld [vmem:[%s3148_s4 + $0xd0] sm:$0xff] }
   0x8   :  { %v2306_v29 = vpack.c.bf16 %v1718_v28, %v1717_v27  ;;  %v1720_v31 = vld [vmem:[%s3148_s4 + $0xd8] sm:$0xff]  ;;  %v1721_v33 = vld [vmem:[%s3148_s4 + $0xe0] sm:$0xff]  ;;  %v1722_v34 = vld [vmem:[%s3148_s4 + $0xe8] sm:$0xff] }
   0x9   :  { %2285 = vmatpush3.bf16.msra.mxu0 %v2282_v6  ;;  %v2310_v32 = vpack.c.bf16 %v1720_v31, %v1719_v30  ;;  %v2314_v35 = vpack.c.bf16 %v1722_v34, %v1721_v33  ;;  %v1723_v36 = vld [vmem:[%s3148_s4 + $0xf0] sm:$0xff]  ;;  %v1724_v37 = vld [vmem:[%s3148_s4 + $0xf8] sm:$0xff]  ;;  %v277_v39 = vld [vmem:[%s3148_s4] sm:$0xff] }
   0xa   :  { %v2318_v38 = vpack.c.bf16 %v1724_v37, %v1723_v36  ;;  %v278_v40 = vld [vmem:[%s3148_s4 + $0x8] sm:$0xff]  ;;  %v231_v46 = vld [vmem:[%s3149_s1] sm:$0xff]  ;;  %v233_v51 = vld [vmem:[%s3149_s1 + $0x10] sm:$0xff] }
   0xb   :  { %v2322_v41 = vpack.c.bf16 %v278_v40, %v277_v39  ;;  %v232_v50 = vld [vmem:[%s3149_s1 + $0x8] sm:$0xff]  ;;  %v234_v59 = vld [vmem:[%s3149_s1 + $0x18] sm:$0xff]  ;;  %v279_v0 = vld [vmem:[%s3148_s4 + $0x10] sm:$0xff] }
   0xc   :  { %1958 = vmatmul.mubr.msk.f32.vlgmr.msra.gmra.mrb[0].mxu0 %vm47_vm0, %v42_v7  ;;  %v280_v1 = vld [vmem:[%s3148_s4 + $0x18] sm:$0xff]  ;;  %vm2744_vm5 = vmneg %vm260_vm3  ;;  %v283_v21 = vld [vmem:[%s3148_s4 + $0x30] sm:$0xff] }
   0xd   :  { %v284_v22 = vld [vmem:[%s3148_s4 + $0x38] sm:$0xff]  ;;  %v285_v24 = vld [vmem:[%s3148_s4 + $0x40] sm:$0xff]  ;;  %v286_v25 = vld [vmem:[%s3148_s4 + $0x48] sm:$0xff]  ;;  %2100 = vmatprep.mubr.msk.f32.mxu0 %vm2532_vm7, %v2533_v19 }
   0xe   :  { %v287_v27 = vld [vmem:[%s3148_s4 + $0x50] sm:$0xff]  ;;  %v288_v28 = vld [vmem:[%s3148_s4 + $0x58] sm:$0xff]  ;;  %v289_v30 = vld [vmem:[%s3148_s4 + $0x60] sm:$0xff] }
   0xf   :  { %v290_v31 = vld [vmem:[%s3148_s4 + $0x68] sm:$0xff]  ;;  %v291_v33 = vld [vmem:[%s3148_s4 + $0x70] sm:$0xff]  ;;  %v292_v34 = vld [vmem:[%s3148_s4 + $0x78] sm:$0xff] }
  0x10   :  { %v1729_v36 = vld [vmem:[%s3148_s4 + $0x100] sm:$0xff]  ;;  %v1730_v37 = vld [vmem:[%s3148_s4 + $0x108] sm:$0xff]  ;;  %v1731_v39 = vld [vmem:[%s3148_s4 + $0x110] sm:$0xff] }
  0x11   :  { %v1732_v40 = vld [vmem:[%s3148_s4 + $0x118] sm:$0xff] }
  0xdf   :  { %v1959_v9 = vpop.f32.mrb[0].mxu0 }
  0xe0   :  { %v120_v10 = vpop.f32.mrb[1].mxu0 }
  0xe1   :  { %v2286_v11 = vpack.c.bf16 %v1959_v9, %v120_v10  ;;  %v2326_v10 = vpack.c.bf16 %v280_v1, %v279_v0 }
  0xe3   :  { %2287 = vmatprep.subr.bf16.mxu1 %v2286_v11 }
  0xe4   :  { %2289 = vmatpush3.bf16.msra.mxu1 %v2286_v11 }
  0xe5   :  { %2291 = vmatprep.subr.bf16.mxu1 %v2290_v18 }
  0xe7   :  { %1965 = vmatmul.mubr.msk.f32.vlgmr.msra.gmra.mrb[0].mxu1 %vm133_vm1, %v130_v12 }
  0xe8   :  { %1967 = vmatprep.mubr.msk.f32.mxu1 %vm133_vm1, %v131_v13  ;;  %2293 = vmatpush3.bf16.msra.mxu1 %v2290_v18  ;;  %v281_v13 = vld [vmem:[%s3148_s4 + $0x20] sm:$0xff] }
  0xe9   :  { %2295 = vmatprep.subr.bf16.mxu1 %v2294_v20 }
  0xeb   :  { %1968 = vmatmul.mubr.msk.f32.gmra.mrb[2].mxu1 %vm133_vm1, %v132_v14  ;;  %v282_v14 = vld [vmem:[%s3148_s4 + $0x28] sm:$0xff] }
  0xec   :  { %2297 = vmatpush3.bf16.msra.mxu1 %v2294_v20  ;;  %v2330_v20 = vpack.c.bf16 %v282_v14, %v281_v13  ;;  %v626_v13 = vld [vmem:[%s3150_s6 + $0x20] sm:$0xff]  ;;  %v627_v14 = vld [vmem:[%s3150_s6 + $0x28] sm:$0xff] }
  0xed   :  { %2299 = vmatprep.subr.bf16.mxu1 %v2298_v23 }
  0xf0   :  { %2301 = vmatpush3.bf16.msra.mxu1 %v2298_v23  ;;  %v2334_v23 = vpack.c.bf16 %v284_v22, %v283_v21 }
  0xf1   :  { %2303 = vmatprep.subr.bf16.mxu1 %v2302_v26 }
  0xf4   :  { %2305 = vmatpush3.bf16.msra.mxu1 %v2302_v26  ;;  %v2338_v26 = vpack.c.bf16 %v286_v25, %v285_v24 }
  0xf5   :  { %2307 = vmatprep.subr.bf16.mxu1 %v2306_v29 }
  0xf8   :  { %2309 = vmatpush3.bf16.msra.mxu1 %v2306_v29  ;;  %v2342_v29 = vpack.c.bf16 %v288_v28, %v287_v27 }
  0xf9   :  { %2311 = vmatprep.subr.bf16.mxu1 %v2310_v32 }
  0xfc   :  { %2313 = vmatpush3.bf16.msra.mxu1 %v2310_v32  ;;  %v2346_v32 = vpack.c.bf16 %v290_v31, %v289_v30 }
  0xfd   :  { %2315 = vmatprep.subr.bf16.mxu1 %v2314_v35 }
 0x100   :  { %2317 = vmatpush3.bf16.msra.mxu1 %v2314_v35  ;;  %v2350_v35 = vpack.c.bf16 %v292_v34, %v291_v33 }
 0x101   :  { %2319 = vmatprep.subr.bf16.mxu1 %v2318_v38 }
 0x104   :  { %2321 = vmatpush3.bf16.msra.mxu1 %v2318_v38  ;;  %v2354_v38 = vpack.c.bf16 %v1730_v37, %v1729_v36 }
 0x105   :  { %2323 = vmatprep.subr.bf16.mxu1 %v2322_v41 }
 0x1ba   :  { %v1966_v42 = vpop.f32.mrb[0].mxu1 }
 0x1bb   :  { %v212_v43 = vpop.f32.mrb[1].mxu1 }
 0x1bc   :  { %239 = vrot.lane.b32.xlu0 %v212_v43, %s2530_s2  ;;  %v1734_v43 = vld [vmem:[%s3148_s4 + $0x128] sm:$0xff] }
 0x1be   :  { %v1969_v44 = vpop.f32.mrb[2].mxu1 }
 0x1bf   :  { %v222_v45 = vpop.f32.mrb[3].mxu1 }
 0x1c0   :  { %241 = vrot.lane.b32.xlu0 %v1966_v42, %s2530_s2  ;;  %243 = vrot.lane.b32.xlu1 %v222_v45, %s2530_s2  ;;  %v1733_v42 = vld [vmem:[%s3148_s4 + $0x120] sm:$0xff] }
 0x1c4   :  { %245 = vrot.lane.b32.xlu1 %v1969_v44, %s2530_s2 }
 0x22e   :  { %v240_v47 = vpop.permute.xlu0 %239 }
 0x22f   :  { %v252_v48 = vsel %vm251_vm2, %v231_v46, %v240_v47  ;;  %v2362_v46 = vpack.c.bf16 %v1734_v43, %v1733_v42  ;;  %v1735_v47 = vld [vmem:[%s3148_s4 + $0x130] sm:$0xff] }
 0x230   :  { %v261_v49 = vrot.slane %v252_v48, 7  ;;  %v1736_v48 = vld [vmem:[%s3148_s4 + $0x138] sm:$0xff] }
 0x232   :  { %v242_v52 = vpop.permute.xlu0 %241  ;;  %v244_v53 = vpop.permute.xlu1 %243  ;;  %v2696_v56 = vsel %vm260_vm3, 0.0, %v261_v49 }
 0x233   :  { %v253_v54 = vsel %vm251_vm2, %v232_v50, %v242_v52  ;;  %v254_v55 = vsel %vm251_vm2, %v233_v51, %v244_v53  ;;  %v298_v4 = vrot.slane %v2696_v56, 1  ;;  %v500_v45 = vrot.slane %v2696_v56, 2  ;;  %v1737_v51 = vld [vmem:[%s3148_s4 + $0x140] sm:$0xff]  ;;  %v1738_v52 = vld [vmem:[%s3148_s4 + $0x148] sm:$0xff] }
 0x234   :  { %v262_v57 = vrot.slane %v253_v54, 7  ;;  %v2698_v58 = vrot.slane %v254_v55, 7  ;;  %v2366_v50 = vpack.c.bf16 %v1736_v48, %v1735_v47  ;;  %v2370_v53 = vpack.c.bf16 %v1738_v52, %v1737_v51  ;;  %v1739_v54 = vld [vmem:[%s3148_s4 + $0x150] sm:$0xff]  ;;  %v1740_v55 = vld [vmem:[%s3148_s4 + $0x158] sm:$0xff] }
 0x235   :  { %v2374_v56 = vpack.c.bf16 %v1740_v55, %v1739_v54  ;;  %v630_v54 = vld [vmem:[%s3151_s7] sm:$0xf] }
 0x236   :  { %v2704_v60 = vsel %vm260_vm3, %v261_v49, %v262_v57  ;;  %v2707_v61 = vsel %vm260_vm3, %v262_v57, 0.0  ;;  %v2711_v62 = vsel %vm260_vm3, 0.0, %v2698_v58  ;;  %v246_v63 = vpop.permute.xlu1 %245  ;;  %v1741_v57 = vld [vmem:[%s3148_s4 + $0x160] sm:$0xff] }
 0x237   :  { %v301_v2 = vrot.slane %v2707_v61, 1  ;;  %v255_v3 = vsel %vm251_vm2, %v234_v59, %v246_v63  ;;  %v299_v5 = vrot.slane %v2704_v60, 1  ;;  %v303_v9 = vrot.slane %v2711_v62, 1  ;;  %v1744_v63 = vld [vmem:[%s3148_s4 + $0x178] sm:$0xff] }
 0x238   :  { %v265_v6 = vrot.slane %v255_v3, 7  ;;  %v501_v44 = vrot.slane %v2704_v60, 2  ;;  %v503_v1 = vrot.slane %v2707_v61, 2  ;;  %v622_v61 = vld [vmem:[%s3150_s6] sm:$0xff] }
 0x239   :  { %v300_v7 = vsel %vm297_vm4, %v298_v4, %v299_v5  ;;  %v302_v8 = vsel %vm297_vm4, %v299_v5, %v301_v2  ;;  %v505_v2 = vrot.slane %v2711_v62, 2  ;;  %v623_v62 = vld [vmem:[%s3150_s6 + $0x8] sm:$0xff] }
 0x23a   :  { %v2728_v11 = vsel %vm260_vm3, %v2698_v58, %v265_v6  ;;  %v2731_v12 = vsel %vm260_vm3, %v265_v6, 0.0  ;;  %2002 = vmatprep.mubr.f32.mxu1 %v300_v7  ;;  %v504_v5 = vsel %vm499_vm6, %v501_v44, %v503_v1 }
 0x23b   :  { %v306_v15 = vrot.slane %v2731_v12, 1  ;;  %2003 = vmatmul.mubr.f32.vlgmr.msra.gmra.mrb[4].mxu1 %v302_v8  ;;  %v304_v16 = vrot.slane %v2728_v11, 1  ;;  %v506_v3 = vrot.slane %v2728_v11, 2  ;;  %v508_v4 = vrot.slane %v2731_v12, 2 }
 0x23c   :  { %2325 = vmatpush3.bf16.msra.mxu1 %v2322_v41  ;;  %v2358_v41 = vpack.c.bf16 %v1732_v40, %v1731_v39  ;;  %v2387_v8 = vpack.c.bf16 %v623_v62, %v622_v61  ;;  %v1751_v61 = vld [vmem:[%s3153_s5 + $0x40] sm:$0xff]  ;;  %v1752_v62 = vld [vmem:[%s3153_s5 + $0x48] sm:$0xff] }
 0x23d   :  { %v305_v17 = vsel %vm297_vm4, %v303_v9, %v304_v16  ;;  %2327 = vmatprep.subr.bf16.mxu1 %v2326_v10  ;;  %v307_v18 = vsel %vm297_vm4, %v304_v16, %v306_v15  ;;  %v507_v6 = vsel %vm499_vm6, %v505_v2, %v506_v3  ;;  %v509_v7 = vsel %vm499_vm6, %v506_v3, %v508_v4  ;;  %v628_v16 = vld [vmem:[%s3150_s6 + $0x30] sm:$0xff]  ;;  %v620_v2 = vld [vmem:[%s3152_s10] sm:$0x1] }
 0x23e   :  { %2005 = vmatprep.mubr.f32.mxu1 %v305_v17  ;;  %v2531_v9 = vmov 0.0|0.0   ;;  %v2393_v15 = vpack.c.bf16 %v627_v14, %v626_v13  ;;  %v629_v17 = vld [vmem:[%s3150_s6 + $0x38] sm:$0xff]  ;;  %v1755_v13 = vld [vmem:[%s3153_s5 + $0x60] sm:$0xff]  ;;  %v1756_v14 = vld [vmem:[%s3153_s5 + $0x68] sm:$0xff] }
 0x23f   :  { %2006 = vmatmul.mubr.f32.gmra.mrb[6].mxu1 %v307_v18  ;;  %2386 = vmatprep.subr.bf16.mxu0 %v2531_v9  ;;  %v2396_v18 = vpack.c.bf16 %v629_v17, %v628_v16  ;;  %v1757_v16 = vld [vmem:[%s3153_s5 + $0x70] sm:$0xff]  ;;  %v1758_v17 = vld [vmem:[%s3153_s5 + $0x78] sm:$0xff] }
 0x240   :  { %2329 = vmatpush3.bf16.msra.mxu1 %v2326_v10  ;;  %2040 = vmatprep.mubr.msk.f32.mxu1 %vm2744_vm5, %v261_v49  ;;  %v502_v49 = vsel %vm499_vm6, %v500_v45, %v501_v44  ;;  %v624_v10 = vld [vmem:[%s3150_s6 + $0x10] sm:$0xff] }
 0x241   :  { %2331 = vmatprep.subr.bf16.mxu1 %v2330_v20  ;;  %2388 = vmatpush3.bf16.msra.mxu0 %v2387_v8 }
 0x242   :  { %2389 = vmatprep.subr.bf16.mxu0 %v2531_v9 }
 0x244   :  { %2333 = vmatpush3.bf16.msra.mxu1 %v2330_v20 }
 0x245   :  { %2335 = vmatprep.subr.bf16.mxu1 %v2334_v23 }
 0x248   :  { %2337 = vmatpush3.bf16.msra.mxu1 %v2334_v23 }
 0x249   :  { %2339 = vmatprep.subr.bf16.mxu1 %v2338_v26 }
 0x24c   :  { %2341 = vmatpush3.bf16.msra.mxu1 %v2338_v26 }
 0x24d   :  { %2343 = vmatprep.subr.bf16.mxu1 %v2342_v29 }
 0x250   :  { %2345 = vmatpush3.bf16.msra.mxu1 %v2342_v29 }
 0x251   :  { %2347 = vmatprep.subr.bf16.mxu1 %v2346_v32 }
 0x254   :  { %2349 = vmatpush3.bf16.msra.mxu1 %v2346_v32 }
 0x255   :  { %2351 = vmatprep.subr.bf16.mxu1 %v2350_v35 }
 0x258   :  { %2353 = vmatpush3.bf16.msra.mxu1 %v2350_v35 }
 0x259   :  { %2355 = vmatprep.subr.bf16.mxu1 %v2354_v38 }
 0x25b   :  { %2041 = vmatmul.mubr.f32.vlgmr.msra.gmra.mrb[4].mxu1 %v2704_v60  ;;  %v1743_v60 = vld [vmem:[%s3148_s4 + $0x170] sm:$0xff] }
 0x25c   :  { %2043 = vmatprep.mubr.msk.f32.mxu1 %vm2744_vm5, %v2698_v58  ;;  %2357 = vmatpush3.bf16.msra.mxu1 %v2354_v38  ;;  %v1742_v58 = vld [vmem:[%s3148_s4 + $0x168] sm:$0xff]  ;;  %v2382_v0 = vpack.c.bf16 %v1744_v63, %v1743_v60 }
 0x25d   :  { %2359 = vmatprep.subr.bf16.mxu1 %v2358_v41  ;;  %v2378_v59 = vpack.c.bf16 %v1742_v58, %v1741_v57 }
 0x25f   :  { %2044 = vmatmul.mubr.f32.gmra.mrb[6].mxu1 %v2728_v11  ;;  %v625_v11 = vld [vmem:[%s3150_s6 + $0x18] sm:$0xff] }
 0x260   :  { %2361 = vmatpush3.bf16.msra.mxu1 %v2358_v41  ;;  %2078 = vmatprep.mubr.f32.mxu1 %v502_v49  ;;  %v2390_v12 = vpack.c.bf16 %v625_v11, %v624_v10  ;;  %v1753_v10 = vld [vmem:[%s3153_s5 + $0x50] sm:$0xff]  ;;  %v1754_v11 = vld [vmem:[%s3153_s5 + $0x58] sm:$0xff] }
 0x261   :  { %2363 = vmatprep.subr.bf16.mxu1 %v2362_v46 }
 0x262   :  { %2391 = vmatpush3.bf16.msra.mxu0 %v2390_v12 }
 0x263   :  { %2392 = vmatprep.subr.bf16.mxu0 %v2531_v9 }
 0x264   :  { %2365 = vmatpush3.bf16.msra.mxu1 %v2362_v46 }
 0x265   :  { %2367 = vmatprep.subr.bf16.mxu1 %v2366_v50 }
 0x266   :  { %2394 = vmatpush3.bf16.msra.mxu0 %v2393_v15 }
 0x267   :  { %2395 = vmatprep.subr.bf16.mxu0 %v2531_v9 }
 0x268   :  { %2369 = vmatpush3.bf16.msra.mxu1 %v2366_v50 }
 0x269   :  { %2371 = vmatprep.subr.bf16.mxu1 %v2370_v53 }
 0x26a   :  { %2397 = vmatpush3.bf16.msra.mxu0 %v2396_v18 }
 0x26b   :  { %2398 = vmatprep.subr.bf16.mxu0 %v2531_v9 }
 0x26c   :  { %2373 = vmatpush3.bf16.msra.mxu1 %v2370_v53 }
 0x26d   :  { %2375 = vmatprep.subr.bf16.mxu1 %v2374_v56 }
 0x270   :  { %2377 = vmatpush3.bf16.msra.mxu1 %v2374_v56 }
 0x271   :  { %2379 = vmatprep.subr.bf16.mxu1 %v2378_v59 }
 0x274   :  { %2381 = vmatpush3.bf16.msra.mxu1 %v2378_v59 }
 0x275   :  { %2383 = vmatprep.subr.bf16.mxu1 %v2382_v0 }
 0x278   :  { %2385 = vmatpush3.bf16.msra.mxu1 %v2382_v0 }
 0x279   :  { %2482 = vmatprep.subr.bf16.mxu1 %v2531_v9 }
 0x27b   :  { %2079 = vmatmul.mubr.f32.vlgmr.msra.gmra.mrb[4].mxu1 %v504_v5  ;;  %v621_v5 = vld [vmem:[%s3152_s10 + $0x1] sm:$0x1] }
 0x27c   :  { %2081 = vmatprep.mubr.f32.mxu1 %v507_v6 }
 0x27f   :  { %2082 = vmatmul.mubr.f32.gmra.mrb[6].mxu1 %v509_v7 }
 0x280   :  { %2265 = vmatprep.mubr.msk.f32.mxu1 %vm2532_vm7, %v2533_v19 }
 0x34e   :  { %v2877_v20 = vpop.f32.mrb[4].mxu1 }
 0x34f   :  { %v632_v21 = vsel %vm251_vm2, %v2877_v20, 0.0  ;;  %v645_v22 = vmul.f32 %v2877_v20, %v2877_v20  ;;  %v2883_v23 = vpop.f32.mrb[5].mxu1 }
 0x350   :  { %v631_v24 = vsel %vm251_vm2, %v2883_v23, 0.0  ;;  %v644_v25 = vmul.f32 %v2883_v23, %v2883_v23 }
 0x351   :  { %v649_v26 = vsel %vm251_vm2, %v645_v22, 0.0  ;;  %v633_v27 = vadd.f32 %v632_v21, %v631_v24  ;;  %v1005_v21 = vld [vmem:[%s3153_s5] sm:$0xff]  ;;  %v1006_v22 = vld [vmem:[%s3153_s5 + $0x8] sm:$0xff] }
 0x352   :  { %v648_v28 = vsel %vm251_vm2, %v644_v25, 0.0  ;;  %v2891_v29 = vpop.f32.mrb[6].mxu1  ;;  %v2959_v24 = vpack.c.bf16 %v1006_v22, %v1005_v21  ;;  %v1340_v25 = vld [vmem:[%s3154_s8] sm:$0xff] }
 0x353   :  { %v650_v30 = vadd.f32 %v649_v26, %v648_v28  ;;  %v2893_v31 = vpop.f32.mrb[7].mxu1  ;;  %v647_v32 = vmul.f32 %v2891_v29, %v2891_v29  ;;  %v636_v36 = vsel %vm251_vm2, %v2891_v29, 0.0  ;;  %v1341_v26 = vld [vmem:[%s3154_s8 + $0x8] sm:$0xff]  ;;  %v1342_v28 = vld [vmem:[%s3154_s8 + $0x10] sm:$0xff] }
 0x354   :  { %v634_v33 = vsel %vm251_vm2, %v2893_v31, 0.0  ;;  %v646_v34 = vmul.f32 %v2893_v31, %v2893_v31 }
 0x355   :  { %v635_v35 = vadd.f32 %v634_v33, %v633_v27  ;;  %v653_v40 = vsel %vm251_vm2, %v647_v32, 0.0  ;;  %v2968_v27 = vpack.c.bf16 %v1341_v26, %v1340_v25  ;;  %v1344_v33 = vld [vmem:[%s3154_s8 + $0x20] sm:$0xff] }
 0x356   :  { %v651_v37 = vsel %vm251_vm2, %v646_v34, 0.0  ;;  %v1345_v34 = vld [vmem:[%s3154_s8 + $0x28] sm:$0xff] }
 0x357   :  { %v637_v38 = vadd.f32 %v636_v36, %v635_v35  ;;  %v652_v39 = vadd.f32 %v651_v37, %v650_v30  ;;  %v1343_v30 = vld [vmem:[%s3154_s8 + $0x18] sm:$0xff]  ;;  %2484 = vmatpush3.bf16.msra.mxu1 %v2968_v27  ;;  %v2988_v35 = vpack.c.bf16 %v1345_v34, %v1344_v33  ;;  %v967_v36 = vlaneseq  ;;  %v1011_v34 = vld [vmem:[%s3153_s5 + $0x30] sm:$0xff] }
 0x358   :  { %2485 = vmatprep.subr.bf16.mxu1 %v2531_v9  ;;  %v2978_v32 = vpack.c.bf16 %v1343_v30, %v1342_v28 }
 0x359   :  { %v638_v41 = vrot.slane %v637_v38, 4  ;;  %v654_v42 = vadd.f32 %v653_v40, %v652_v39  ;;  %v968_v37 = vshrl.u32 %v967_v36, 7 }
 0x35b   :  { %v639_v43 = vadd.f32 %v638_v41, %v637_v38  ;;  %v655_v46 = vrot.slane %v654_v42, 4  ;;  %2487 = vmatpush3.bf16.msra.mxu1 %v2978_v32  ;;  %v2992_v38 = vsub.s32 0, %v968_v37  ;;  %v1767_v37 = vld [vmem:[%s3153_s5 + $0x80] sm:$0xff] }
 0x35c   :  { %2488 = vmatprep.subr.bf16.mxu1 %v2531_v9 }
 0x35d   :  { %v640_v44 = vrot.slane %v639_v43, 2  ;;  %v656_v48 = vadd.f32 %v655_v46, %v654_v42 }
 0x35f   :  { %v641_v45 = vadd.f32 %v640_v44, %v639_v43  ;;  %v657_v50 = vrot.slane %v656_v48, 2  ;;  %2490 = vmatpush3.bf16.msra.mxu1 %v2988_v35 }
 0x360   :  { %2491 = vmatprep.subr.bf16.mxu1 %v2531_v9 }
 0x361   :  { %v642_v47 = vrot.slane %v641_v45, 1  ;;  %v658_v51 = vadd.f32 %v657_v50, %v656_v48 }
 0x363   :  { %v643_v49 = vadd.f32 %v642_v47, %v641_v45  ;;  %v659_v52 = vrot.slane %v658_v51, 1 }
 0x365   :  { %2101 = vmatmul.mubr.msk.f32.vlgmr.msra.gmra.mrb[2].mxu0 %vm251_vm2, %v643_v49  ;;  %v660_v53 = vadd.f32 %v659_v52, %v658_v51 }
 0x366   :  { %2400 = vmatpush3.bf16.msra.mxu0 %v2387_v8  ;;  %2119 = vmatprep.mubr.msk.f32.mxu0 %vm2532_vm7, %v2533_v19  ;;  %v2410_v8 = vpack.c.bf16 %v1752_v62, %v1751_v61 }
 0x367   :  { %2401 = vmatprep.subr.bf16.mxu0 %v2531_v9 }
 0x36a   :  { %2403 = vmatpush3.bf16.msra.mxu0 %v2390_v12  ;;  %v2414_v12 = vpack.c.bf16 %v1754_v11, %v1753_v10 }
 0x36b   :  { %2404 = vmatprep.subr.bf16.mxu0 %v2531_v9 }
 0x36e   :  { %2406 = vmatpush3.bf16.msra.mxu0 %v2393_v15  ;;  %v2418_v15 = vpack.c.bf16 %v1756_v14, %v1755_v13  ;;  %v1009_v13 = vld [vmem:[%s3153_s5 + $0x20] sm:$0xff]  ;;  %v1010_v14 = vld [vmem:[%s3153_s5 + $0x28] sm:$0xff] }
 0x36f   :  { %2407 = vmatprep.subr.bf16.mxu0 %v2531_v9  ;;  %v2434_v30 = vpack.c.bf16 %v1010_v14, %v1009_v13 }
 0x372   :  { %2409 = vmatpush3.bf16.msra.mxu0 %v2396_v18  ;;  %v2422_v18 = vpack.c.bf16 %v1758_v17, %v1757_v16 }
 0x373   :  { %2122 = vmatprep.subr.mxu0 %v2533_v19 }
 0x375   :  { %2120 = vmatmul.mubr.msk.f32.vlgmr.msra.gmra.mrb[4].mxu0 %vm251_vm2, %v660_v53 }
 0x376   :  { %2124 = vmatprep.mubr.msk.f32.mxu0 %vm2532_vm7, %v2533_v19  ;;  %2123 = vmatpush3.msk.msra.mxu0 %vm820_vm8, %v630_v54 }
 0x377   :  { %2127 = vmatprep.subr.mxu0 %v2533_v19 }
 0x438   :  { %v730_v55 = vpop.f32.mrb[2].mxu0 }
 0x439   :  { %v2102_v56 = vpop.f32.mrb[3].mxu0  ;;  %v807_v57 = vmul.f32 0.001953125, %v730_v55 }
 0x43b   :  { %v809_v59 = vmul.f32 %v807_v57, %v807_v57 }
 0x448   :  { %v803_v58 = vpop.f32.mrb[4].mxu0 }
 0x449   :  { %v808_v60 = vmul.f32 0.001953125, %v803_v58  ;;  %v2121_v63 = vpop.f32.mrb[5].mxu0 }
 0x44b   :  { %v810_v0 = vsub.f32 %v808_v60, %v809_v59 }
 0x44d   :  { %v811_v1 = vadd.f32 1e-05, %v810_v0 }
 0x44f   :  { %2526 = vrsqrt.f32 %v811_v1 }
 0x459   :  { %v2527_v3 = vpop.eup %2526 }
 0x45a   :  { %v813_v4 = vmul.f32 %v2527_v3, %v620_v2 }
 0x45c   :  { %2125 = vmatmul.mubr.msk.f32.vlgmr.msra.gmra.mrb[6].mxu0 %vm816_vm9, %v813_v4  ;;  %v814_v6 = vmul.f32 %v813_v4, %v807_v57 }
 0x45d   :  { %2128 = vmatpush3.msk.msra.mxu0 %vm820_vm8, %v630_v54  ;;  %2129 = vmatprep.mubr.msk.f32.mxu0 %vm2532_vm7, %v2533_v19 }
 0x45e   :  { %v815_v7 = vsub.f32 %v621_v5, %v814_v6  ;;  %2411 = vmatprep.subr.bf16.mxu0 %v2410_v8 }
 0x460   :  { %2130 = vmatmul.mubr.msk.f32.vlgmr.msra.gmra.mrb[8].mxu0 %vm816_vm9, %v815_v7 }
 0x461   :  { %2413 = vmatpush3.bf16.msra.mxu0 %v2410_v8 }
 0x462   :  { %2415 = vmatprep.subr.bf16.mxu0 %v2414_v12 }
 0x465   :  { %2417 = vmatpush3.bf16.msra.mxu0 %v2414_v12 }
 0x466   :  { %2419 = vmatprep.subr.bf16.mxu0 %v2418_v15 }
 0x469   :  { %2421 = vmatpush3.bf16.msra.mxu0 %v2418_v15 }
 0x46a   :  { %2423 = vmatprep.subr.bf16.mxu0 %v2422_v18 }
 0x46d   :  { %2425 = vmatpush3.bf16.msra.mxu0 %v2422_v18 }
 0x46e   :  { %2427 = vmatprep.subr.bf16.mxu0 %v2959_v24 }
 0x52f   :  { %v890_v39 = vpop.f32.mrb[6].mxu0 }
 0x530   :  { %v970_v40 = vrot.slane %v890_v39, %v2992_v38  ;;  %v2126_v41 = vpop.f32.mrb[7].mxu0  ;;  %v1768_v39 = vld [vmem:[%s3153_s5 + $0x88] sm:$0xff] }
 0x531   :  { %v1769_v41 = vld [vmem:[%s3153_s5 + $0x90] sm:$0xff] }
 0x532   :  { %v971_v42 = vmul.f32 %v970_v40, %v2883_v23  ;;  %v972_v43 = vmul.f32 %v2877_v20, %v970_v40  ;;  %v973_v44 = vmul.f32 %v970_v40, %v2893_v31  ;;  %v974_v45 = vmul.f32 %v2891_v29, %v970_v40  ;;  %v1007_v20 = vld [vmem:[%s3153_s5 + $0x10] sm:$0xff]  ;;  %v1008_v23 = vld [vmem:[%s3153_s5 + $0x18] sm:$0xff] }
 0x533   :  { %v963_v46 = vpop.f32.mrb[8].mxu0  ;;  %v2430_v59 = vpack.c.bf16 %v1008_v23, %v1007_v20  ;;  %v2442_v40 = vpack.c.bf16 %v1768_v39, %v1767_v37  ;;  %v1353_v20 = vld [vmem:[%s3154_s8 + $0x68] sm:$0xff]  ;;  %v1338_v39 = vld [vmem:[%s3156_s11] sm:$0x1] }
 0x534   :  { %v978_v47 = vrot.slane %v963_v46, %v2992_v38  ;;  %v2131_v48 = vpop.f32.mrb[9].mxu0 }
 0x535   :  { %v1774_v48 = vld [vmem:[%s3153_s5 + $0xb8] sm:$0xff] }
 0x536   :  { %v979_v49 = vadd.f32 %v978_v47, %v971_v42  ;;  %v980_v50 = vadd.f32 %v978_v47, %v972_v43  ;;  %v981_v51 = vadd.f32 %v978_v47, %v973_v44  ;;  %v982_v52 = vadd.f32 %v978_v47, %v974_v45  ;;  %v1770_v42 = vld [vmem:[%s3153_s5 + $0x98] sm:$0xff]  ;;  %v1771_v44 = vld [vmem:[%s3153_s5 + $0xa0] sm:$0xff]  ;;  %v1772_v45 = vld [vmem:[%s3153_s5 + $0xa8] sm:$0xff] }
 0x537   :  { %v2446_v43 = vpack.c.bf16 %v1770_v42, %v1769_v41  ;;  %v2450_v46 = vpack.c.bf16 %v1772_v45, %v1771_v44  ;;  %v1773_v47 = vld [vmem:[%s3153_s5 + $0xb0] sm:$0xff]  ;;  %v1339_v42 = vld [vmem:[%s3156_s11 + $0x1] sm:$0x1] }
 0x538   :  { %v983_v53 = vmax.f32 %v979_v49, 0.0  ;;  %v984_v54 = vmax.f32 %v980_v50, 0.0  ;;  %v985_v55 = vmax.f32 %v981_v51, 0.0  ;;  %v986_v56 = vmax.f32 %v982_v52, 0.0  ;;  %v1346_v50 = vld [vmem:[%s3154_s8 + $0x30] sm:$0xff] }
 0x539   :  { %v2454_v49 = vpack.c.bf16 %v1774_v48, %v1773_v47 }
 0x53a   :  { %v991_v29 = vrot.slane %v983_v53, 7  ;;  %v992_v31 = vrot.slane %v984_v54, 7  ;;  %v994_v57 = vrot.slane %v985_v55, 7  ;;  %v995_v58 = vrot.slane %v986_v56, 7  ;;  %v1350_v53 = vld [vmem:[%s3154_s8 + $0x50] sm:$0xff]  ;;  %v1351_v54 = vld [vmem:[%s3154_s8 + $0x58] sm:$0xff] }
 0x53b   :  { %v2474_v55 = vpack.c.bf16 %v1351_v54, %v1350_v53  ;;  %v1352_v56 = vld [vmem:[%s3154_s8 + $0x60] sm:$0xff] }
 0x53c   :  { %v993_v60 = vsel %vm260_vm3, %v991_v29, %v992_v31  ;;  %v1001_v63 = vsel %vm260_vm3, 0.0, %v991_v29  ;;  %v1003_v0 = vsel %vm260_vm3, %v992_v31, 0.0  ;;  %v996_v1 = vsel %vm260_vm3, %v994_v57, %v995_v58  ;;  %v1354_v29 = vld [vmem:[%s3154_s8 + $0x70] sm:$0xff]  ;;  %v1355_v31 = vld [vmem:[%s3154_s8 + $0x78] sm:$0xff] }
 0x53d   :  { %v1017_v2 = vrot.slane %v1001_v63, 1  ;;  %v1018_v3 = vrot.slane %v993_v60, 1  ;;  %v1020_v4 = vrot.slane %v1003_v0, 1  ;;  %v1225_v5 = vrot.slane %v1003_v0, 2 }
 0x53e   :  { %v1002_v6 = vsel %vm260_vm3, 0.0, %v994_v57  ;;  %v1023_v7 = vrot.slane %v996_v1, 1  ;;  %v1004_v61 = vsel %vm260_vm3, %v995_v58, 0.0  ;;  %v1222_v62 = vrot.slane %v1001_v63, 2 }
 0x53f   :  { %v1019_v8 = vsel %vm297_vm4, %v1017_v2, %v1018_v3  ;;  %v1021_v10 = vsel %vm297_vm4, %v1018_v3, %v1020_v4  ;;  %v1022_v11 = vrot.slane %v1002_v6, 1  ;;  %v1025_v12 = vrot.slane %v1004_v61, 1 }
 0x540   :  { %2148 = vmatprep.mubr.msk.f32.mxu0 %vm251_vm2, %v1019_v8  ;;  %v1223_v15 = vrot.slane %v993_v60, 2  ;;  %v1227_v16 = vrot.slane %v1002_v6, 2  ;;  %v1228_v17 = vrot.slane %v996_v1, 2  ;;  %v1230_v18 = vrot.slane %v1004_v61, 2 }
 0x541   :  { %2149 = vmatmul.mubr.msk.f32.vlgmr.msra.gmra.mrb[10].mxu0 %vm251_vm2, %v1021_v10  ;;  %v1024_v21 = vsel %vm297_vm4, %v1022_v11, %v1023_v7  ;;  %v1026_v22 = vsel %vm297_vm4, %v1023_v7, %v1025_v12  ;;  %v2477_v23 = vpack.c.bf16 %v1353_v20, %v1352_v56  ;;  %v2480_v57 = vpack.c.bf16 %v1355_v31, %v1354_v29 }
 0x542   :  { %2429 = vmatpush3.bf16.msra.mxu0 %v2959_v24  ;;  %2151 = vmatprep.mubr.msk.f32.mxu0 %vm251_vm2, %v1024_v21  ;;  %v1224_v25 = vsel %vm499_vm6, %v1222_v62, %v1223_v15  ;;  %v1226_v26 = vsel %vm499_vm6, %v1223_v15, %v1225_v5  ;;  %v1229_v28 = vsel %vm499_vm6, %v1227_v16, %v1228_v17  ;;  %v1012_v24 = vld [vmem:[%s3153_s5 + $0x38] sm:$0xff] }
 0x543   :  { %2431 = vmatprep.subr.bf16.mxu0 %v2430_v59  ;;  %v1231_v33 = vsel %vm499_vm6, %v1228_v17, %v1230_v18  ;;  %v2438_v36 = vpack.c.bf16 %v1012_v24, %v1011_v34 }
 0x545   :  { %2152 = vmatmul.mubr.msk.f32.gmra.mrb[12].mxu0 %vm251_vm2, %v1026_v22  ;;  %v1356_v22 = vld [vmem:[%s3155_s9] sm:$0xff] }
 0x546   :  { %2433 = vmatpush3.bf16.msra.mxu0 %v2430_v59  ;;  %2170 = vmatprep.mubr.msk.f32.mxu0 %vm251_vm2, %v1001_v63 }
 0x547   :  { %2435 = vmatprep.subr.bf16.mxu0 %v2434_v30 }
 0x54a   :  { %2437 = vmatpush3.bf16.msra.mxu0 %v2434_v30 }
 0x54b   :  { %2439 = vmatprep.subr.bf16.mxu0 %v2438_v36 }
 0x54e   :  { %2441 = vmatpush3.bf16.msra.mxu0 %v2438_v36 }
 0x54f   :  { %2443 = vmatprep.subr.bf16.mxu0 %v2442_v40 }
 0x551   :  { %2171 = vmatmul.mubr.msk.f32.vlgmr.msra.gmra.mrb[10].mxu0 %vm251_vm2, %v993_v60 }
 0x552   :  { %2173 = vmatprep.mubr.msk.f32.mxu0 %vm251_vm2, %v1002_v6  ;;  %2445 = vmatpush3.bf16.msra.mxu0 %v2442_v40 }
 0x553   :  { %2447 = vmatprep.subr.bf16.mxu0 %v2446_v43 }
 0x555   :  { %2174 = vmatmul.mubr.msk.f32.gmra.mrb[12].mxu0 %vm251_vm2, %v996_v1 }
 0x556   :  { %2449 = vmatpush3.bf16.msra.mxu0 %v2446_v43  ;;  %2192 = vmatprep.mubr.msk.f32.mxu0 %vm251_vm2, %v1224_v25 }
 0x557   :  { %2451 = vmatprep.subr.bf16.mxu0 %v2450_v46 }
 0x55a   :  { %2453 = vmatpush3.bf16.msra.mxu0 %v2450_v46 }
 0x55b   :  { %2455 = vmatprep.subr.bf16.mxu0 %v2454_v49 }
 0x55e   :  { %2457 = vmatpush3.bf16.msra.mxu0 %v2454_v49 }
 0x55f   :  { %2458 = vmatprep.subr.bf16.mxu0 %v2531_v9 }
 0x561   :  { %2193 = vmatmul.mubr.msk.f32.vlgmr.msra.gmra.mrb[10].mxu0 %vm251_vm2, %v1226_v26 }
 0x562   :  { %2195 = vmatprep.mubr.msk.f32.mxu0 %vm251_vm2, %v1229_v28  ;;  %2460 = vmatpush3.bf16.msra.mxu0 %v2968_v27  ;;  %v1347_v27 = vld [vmem:[%s3154_s8 + $0x38] sm:$0xff] }
 0x563   :  { %2461 = vmatprep.subr.bf16.mxu0 %v2531_v9  ;;  %v2468_v51 = vpack.c.bf16 %v1347_v27, %v1346_v50 }
 0x565   :  { %2196 = vmatmul.mubr.msk.f32.gmra.mrb[12].mxu0 %vm251_vm2, %v1231_v33  ;;  %2493 = vmatpush3.bf16.msra.mxu1 %v2468_v51 }
 0x566   :  { %2463 = vmatpush3.bf16.msra.mxu0 %v2978_v32  ;;  %2230 = vmatprep.mubr.msk.f32.mxu0 %vm2532_vm7, %v2533_v19  ;;  %v1348_v32 = vld [vmem:[%s3154_s8 + $0x40] sm:$0xff] }
 0x567   :  { %2464 = vmatprep.subr.bf16.mxu0 %v2531_v9  ;;  %2494 = vmatprep.subr.bf16.mxu1 %v2531_v9 }
 0x56a   :  { %2466 = vmatpush3.bf16.msra.mxu0 %v2988_v35  ;;  %v1349_v35 = vld [vmem:[%s3154_s8 + $0x48] sm:$0xff] }
 0x56b   :  { %2467 = vmatprep.subr.bf16.mxu0 %v2531_v9  ;;  %v2471_v52 = vpack.c.bf16 %v1349_v35, %v1348_v32 }
 0x56d   :  { %2496 = vmatpush3.bf16.msra.mxu1 %v2471_v52 }
 0x56e   :  { %2469 = vmatpush3.bf16.msra.mxu0 %v2468_v51  ;;  %2497 = vmatprep.subr.bf16.mxu1 %v2531_v9 }
 0x56f   :  { %2470 = vmatprep.subr.bf16.mxu0 %v2531_v9 }
 0x571   :  { %2499 = vmatpush3.bf16.msra.mxu1 %v2474_v55 }
 0x572   :  { %2472 = vmatpush3.bf16.msra.mxu0 %v2471_v52  ;;  %2500 = vmatprep.subr.bf16.mxu1 %v2531_v9 }
 0x573   :  { %2473 = vmatprep.subr.bf16.mxu0 %v2531_v9 }
 0x575   :  { %2502 = vmatpush3.bf16.msra.mxu1 %v2477_v23 }
 0x576   :  { %2475 = vmatpush3.bf16.msra.mxu0 %v2474_v55  ;;  %2503 = vmatprep.subr.bf16.mxu1 %v2531_v9 }
 0x577   :  { %2476 = vmatprep.subr.bf16.mxu0 %v2531_v9 }
 0x579   :  { %2505 = vmatpush3.bf16.msra.mxu1 %v2480_v57 }
 0x57a   :  { %2478 = vmatpush3.bf16.msra.mxu0 %v2477_v23 }
 0x57b   :  { %2479 = vmatprep.subr.bf16.mxu0 %v2531_v9 }
 0x57e   :  { %2481 = vmatpush3.bf16.msra.mxu0 %v2480_v57 }
 0x57f   :  { %2268 = vmatprep.subr.mxu0 %v2533_v19 }
 0x634   :  { %v2194_v58 = vpop.f32.mrb[10].mxu0 }
 0x635   :  { %v1367_v59 = vmul.f32 %v2194_v58, %v2194_v58  ;;  %v1315_v60 = vpop.f32.mrb[11].mxu0 }
 0x636   :  { %v1357_v63 = vadd.f32 %v2194_v58, %v1315_v60  ;;  %v1366_v0 = vmul.f32 %v1315_v60, %v1315_v60 }
 0x638   :  { %v1370_v1 = vadd.f32 %v1367_v59, %v1366_v0  ;;  %v2197_v2 = vpop.f32.mrb[12].mxu0 }
 0x639   :  { %v1325_v3 = vpop.f32.mrb[13].mxu0  ;;  %v1369_v6 = vmul.f32 %v2197_v2, %v2197_v2 }
 0x63a   :  { %v1358_v4 = vadd.f32 %v1357_v63, %v1325_v3  ;;  %v1368_v5 = vmul.f32 %v1325_v3, %v1325_v3 }
 0x63c   :  { %v1359_v7 = vadd.f32 %v2197_v2, %v1358_v4  ;;  %v1371_v61 = vadd.f32 %v1370_v1, %v1368_v5 }
 0x63e   :  { %v1360_v62 = vrot.slane %v1359_v7, 4  ;;  %v1372_v9 = vadd.f32 %v1371_v61, %v1369_v6 }
 0x640   :  { %v1361_v8 = vadd.f32 %v1360_v62, %v1359_v7  ;;  %v1373_v10 = vrot.slane %v1372_v9, 4 }
 0x642   :  { %v1362_v11 = vrot.slane %v1361_v8, 2  ;;  %v1374_v12 = vadd.f32 %v1373_v10, %v1372_v9 }
 0x644   :  { %v1363_v13 = vadd.f32 %v1362_v11, %v1361_v8  ;;  %v1375_v14 = vrot.slane %v1374_v12, 2 }
 0x646   :  { %v1364_v15 = vrot.slane %v1363_v13, 1  ;;  %v1376_v16 = vadd.f32 %v1375_v14, %v1374_v12 }
 0x648   :  { %v1365_v17 = vadd.f32 %v1364_v15, %v1363_v13  ;;  %v1377_v18 = vrot.slane %v1376_v16, 1 }
 0x64a   :  { %2231 = vmatmul.mubr.f32.vlgmr.msra.gmra.mrb[14].mxu0 %v1365_v17  ;;  %v1378_v21 = vadd.f32 %v1377_v18, %v1376_v16 }
 0x64b   :  { %2270 = vmatprep.mubr.msk.f32.mxu0 %vm2532_vm7, %v2533_v19  ;;  %2269 = vmatpush3.msra.mxu0 %v1356_v22 }
 0x64c   :  { %2266 = vmatmul.mubr.f32.vlgmr.msra.gmra.mrb[8].mxu1 %v1378_v21  ;;  %2273 = vmatprep.subr.mxu0 %v2533_v19 }
 0x71d   :  { %v1445_v25 = vpop.f32.mrb[14].mxu0 }
 0x71e   :  { %v1519_v26 = vmul.f32 0.001953125, %v1445_v25  ;;  %v2232_v28 = vpop.f32.mrb[15].mxu0 }
 0x71f   :  { %v1515_v30 = vpop.f32.mrb[8].mxu1 }
 0x720   :  { %v1521_v33 = vmul.f32 %v1519_v26, %v1519_v26  ;;  %v1520_v34 = vmul.f32 0.001953125, %v1515_v30  ;;  %v2267_v24 = vpop.f32.mrb[9].mxu1 }
 0x722   :  { %v1522_v36 = vsub.f32 %v1520_v34, %v1521_v33 }
 0x724   :  { %v1523_v37 = vadd.f32 1e-05, %v1522_v36 }
 0x726   :  { %2528 = vrsqrt.f32 %v1523_v37 }
 0x730   :  { %v2529_v40 = vpop.eup %2528 }
 0x731   :  { %v1525_v41 = vmul.f32 %v2529_v40, %v1338_v39 }
 0x733   :  { %2271 = vmatmul.mubr.msk.f32.vlgmr.msra.gmra.mrb[16].mxu0 %vm1528_vm10, %v1525_v41  ;;  %v1526_v43 = vmul.f32 %v1525_v41, %v1519_v26 }
 0x734   :  { %2274 = vmatpush3.msra.mxu0 %v1356_v22  ;;  %2275 = vmatprep.mubr.msk.f32.mxu0 %vm2532_vm7, %v2533_v19 }
 0x735   :  { %v1527_v44 = vsub.f32 %v1339_v42, %v1526_v43 }
 0x737   :  { %2276 = vmatmul.mubr.msk.f32.vlgmr.msra.gmra.mrb[18].mxu0 %vm1528_vm10, %v1527_v44 }
 0x806   :  { %v1598_v45 = vpop.f32.mrb[16].mxu0 }
 0x807   :  { %v1678_v46 = vrot.slane %v1598_v45, %v2992_v38  ;;  %v2272_v47 = vpop.f32.mrb[17].mxu0 }
 0x809   :  { %v1679_v48 = vmul.f32 %v1678_v46, %v1315_v60  ;;  %v1680_v49 = vmul.f32 %v2194_v58, %v1678_v46  ;;  %v1681_v50 = vmul.f32 %v1678_v46, %v1325_v3  ;;  %v1682_v27 = vmul.f32 %v2197_v2, %v1678_v46 }
 0x80a   :  { %v1671_v51 = vpop.f32.mrb[18].mxu0 }
 0x80b   :  { %v1686_v32 = vrot.slane %v1671_v51, %v2992_v38  ;;  %v2277_v35 = vpop.f32.mrb[19].mxu0 }
 0x80d   :  { %v1687_v52 = vadd.f32 %v1686_v32, %v1679_v48  ;;  %v1688_v53 = vadd.f32 %v1686_v32, %v1680_v49  ;;  %v1689_v54 = vadd.f32 %v1686_v32, %v1681_v50  ;;  %v1690_v55 = vadd.f32 %v1686_v32, %v1682_v27 }
 0x80f   :  { %v1691_v56 = vmax.f32 %v1687_v52, 0.0  ;;  %v1692_v19 = vmax.f32 %v1688_v53, 0.0  ;;  %v1693_v20 = vmax.f32 %v1689_v54, 0.0  ;;  %v1694_v23 = vmax.f32 %v1690_v55, 0.0 }
 0x811   :  { %1695 = vst [vmem:[%s3157_s12] sm:$0xff] %v1691_v56  ;;  %1696 = vst [vmem:[%s3157_s12 + $0x8] sm:$0xff] %v1692_v19 }
 0x812   :  { %1697 = vst [vmem:[%s3157_s12 + $0x10] sm:$0xff] %v1693_v20  ;;  %1698 = vst [vmem:[%s3157_s12 + $0x18] sm:$0xff] %v1694_v23 }

</bundles_post_ra>
